<compile_context>
chip_gen: v7x
topology: tpu7x:2x2x1
jax: 0.10.0
libtpu: 0.0.40
codegen_flags: <defaults>
</compile_context>

<pallas_src>
import math
import functools

import jax
import jax.numpy as jnp
from jax.experimental import pallas as pl
from jax.experimental.pallas import tpu as pltpu


def _round_up(x, m):
    return ((x + m - 1) // m) * m


def _multilinear_kernel(regions_ref, x_ref, w_ref, b_ref, o_ref, *, compute_dtype):
    # regions_ref: (n_regions,) int32 scalar-prefetch ref (consumed by index_maps only)
    # x_ref: (batch, in_features)   -- resident across the whole grid
    # w_ref: (1, in_features, tn)   -- gathered weight tile for region c, out-tile j
    # b_ref: (1, 1, tn)             -- gathered bias tile for region c, out-tile j
    # o_ref: (1, batch, tn)
    del regions_ref
    x = x_ref[...].astype(compute_dtype)               # (B, K)
    w = w_ref[0].astype(compute_dtype)                 # (K, tn)
    acc = jnp.dot(x, w, preferred_element_type=jnp.float32)   # (B, tn) f32 on MXU
    b = b_ref[0, 0].astype(jnp.float32)                # (tn,)
    o_ref[0] = (acc + b[None, :]).astype(o_ref.dtype)


def multilinear_forward(x, weight, bias, regions_oi, *,
                        compute_dtype=jnp.bfloat16,
                        weight_tile_budget_bytes=8 * 1024 * 1024):
    """x: (in_features, batch)
       weight: (n_heads, in_features, out_features)
       bias: (n_heads, out_features)
       regions_oi: (n_regions,) int
       returns: (n_regions, batch, out_features) in x.dtype
    """
    in_features, batch = x.shape
    n_heads, in_w, out_features = weight.shape
    assert in_w == in_features
    n_regions = regions_oi.shape[0]
    out_dtype = x.dtype
    regions_oi = regions_oi.astype(jnp.int32)

    # ---- pick a lane-dense out_features tile (multiple of 128) that keeps the
    #      double-buffered weight tile inside a fixed VMEM budget --------------
    wbytes = jnp.dtype(weight.dtype).itemsize
    n128 = _round_up(out_features, 128)
    tn = 128
    for cand in (1024, 512, 256, 128):
        if cand <= n128 and 2 * in_features * cand * wbytes <= weight_tile_budget_bytes:
            tn = cand
            break
    n_pad = _round_up(out_features, tn)
    n_tiles = n_pad // tn

    # ---- one-time, loop-invariant layout plumbing in the wrapper ------------
    xt = jnp.transpose(x)                               # (batch, in_features)
    if xt.dtype != compute_dtype:
        xt = xt.astype(compute_dtype)                   # halves resident-x bytes for bf16
    if n_pad != out_features:
        weight = jnp.pad(weight, ((0, 0), (0, 0), (0, n_pad - out_features)))
        bias = jnp.pad(bias, ((0, 0), (0, n_pad - out_features)))
    bias3 = bias.reshape(n_heads, 1, n_pad)

    grid_spec = pltpu.PrefetchScalarGridSpec(
        num_scalar_prefetch=1,
        grid=(n_regions, n_tiles),
        in_specs=[
            # full input resident every step (block == full array dims)
            pl.BlockSpec((batch, in_features), lambda c, j, regions: (0, 0)),
            # data-dependent gather of the weight tile for region c, out-tile j
            pl.BlockSpec((1, in_features, tn),
                         lambda c, j, regions: (regions[c], 0, j)),
            # data-dependent gather of the bias tile for region c, out-tile j
            pl.BlockSpec((1, 1, tn),
                         lambda c, j, regions: (regions[c], 0, j)),
        ],
        out_specs=pl.BlockSpec((1, batch, tn),
                               lambda c, j, regions: (c, 0, j)),
    )

    flops = 2 * n_regions * batch * in_features * n_pad
    bytes_accessed = (
        n_regions * in_features * n_pad * wbytes                      # gathered weight
        + xt.size * jnp.dtype(xt.dtype).itemsize                      # resident x
        + n_regions * n_pad * jnp.dtype(bias.dtype).itemsize          # gathered bias
        + n_regions * batch * n_pad * jnp.dtype(out_dtype).itemsize)  # output

    out = pl.pallas_call(
        functools.partial(_multilinear_kernel, compute_dtype=compute_dtype),
        out_shape=jax.ShapeDtypeStruct((n_regions, batch, n_pad), out_dtype),
        grid_spec=grid_spec,
        compiler_params=pltpu.CompilerParams(
            dimension_semantics=("parallel", "parallel"),
            vmem_limit_bytes=48 * 1024 * 1024,
        ),
        cost_estimate=pl.CostEstimate(
            flops=flops, transcendentals=0, bytes_accessed=bytes_accessed),
    )(regions_oi, xt, weight, bias3)

    if n_pad != out_features:
        out = out[:, :, :out_features]
    return out


def _init_params(key, n_heads, in_features, out_features):
    # Mirrors the PyTorch default constructors:
    #   stdv = 1/sqrt(shape[-1]);  uniform_(-stdv, stdv)
    kw, kb = jax.random.split(key)
    stdv_w = 1.0 / math.sqrt(out_features)   # shape[-1] of (in, out)
    stdv_b = 1.0 / math.sqrt(out_features)   # shape[-1] of (out,)
    weight = jax.random.uniform(
        kw, (n_heads, in_features, out_features), jnp.float32,
        minval=-stdv_w, maxval=stdv_w)
    bias = jax.random.uniform(
        kb, (n_heads, out_features), jnp.float32,
        minval=-stdv_b, maxval=stdv_b)
    return weight, bias


if __name__ == "__main__":
    key = jax.random.PRNGKey(0)
    k_x, k_p = jax.random.split(key)

    in_features = 32
    out_features = 16
    n_heads = 4
    batch = 8
    n_regions = 3

    x = jax.random.normal(k_x, (in_features, batch), jnp.float32)
    weight, bias = _init_params(k_p, n_heads, in_features, out_features)
    regions_oi = jnp.array([2, 0, 1], dtype=jnp.int32)

    # reference (pure JAX) of the einsum + bias semantics
    w_g = weight[regions_oi]            # (c, a, d)
    b_g = bias[regions_oi]              # (c, d)
    ref = jnp.einsum("ab,cad->cbd", x, w_g) + b_g[:, None, :]

    # exactness path: f32 compute
    out_f32 = jax.block_until_ready(
        multilinear_forward(x, weight, bias, regions_oi, compute_dtype=jnp.float32))
    assert out_f32.shape == (n_regions, batch, out_features)
    assert jnp.allclose(out_f32, ref, atol=1e-5, rtol=1e-5)

    # fast path (default): bf16 MXU inputs with f32 accumulation
    out_bf16 = jax.block_until_ready(
        multilinear_forward(x, weight, bias, regions_oi))
    assert out_bf16.shape == (n_regions, batch, out_features)
    assert jnp.allclose(out_bf16, ref, atol=2e-2, rtol=2e-2)

    print("KERNEL_OK")
</pallas_src>

<mosaic_0001>
module attributes {stable_mosaic.version = 11 : i64} {
  func.func @_multilinear_kernel(%arg0: i32, %arg1: i32, %arg2: memref<3xi32, #tpu.memory_space<smem>>, %arg3: memref<8x32xf32, #tpu.memory_space<vmem>>, %arg4: memref<1x32x128xf32, #tpu.memory_space<vmem>>, %arg5: memref<1x1x128xf32, #tpu.memory_space<vmem>>, %arg6: memref<1x8x128xf32, #tpu.memory_space<vmem>>) attributes {dimension_semantics = [#tpu.dimension_semantics<parallel>, #tpu.dimension_semantics<parallel>], iteration_bounds = array<i64: 3, 1>, scalar_prefetch = 1 : i64, scratch_operands = 0 : i64, tpu.core_type = #tpu.core_type<tc>, window_params = [{pipeline_mode = #tpu.pipeline_mode<synchronous>, transform_indices = @transform_0, window_bounds = array<i64: 8, 32>}, {transform_indices = @transform_1, window_bounds = array<i64: 1, 32, 128>}, {transform_indices = @transform_2, window_bounds = array<i64: 1, 1, 128>}, {transform_indices = @transform_3, window_bounds = array<i64: 1, 8, 128>}]} {
    %c0 = arith.constant 0 : index
    %c0_0 = arith.constant 0 : index
    %0 = vector.load %arg3[%c0, %c0_0] : memref<8x32xf32, #tpu.memory_space<vmem>>, vector<8x32xf32>
    %c0_1 = arith.constant 0 : index
    %c0_2 = arith.constant 0 : index
    %c0_3 = arith.constant 0 : index
    %1 = vector.load %arg4[%c0_1, %c0_2, %c0_3] : memref<1x32x128xf32, #tpu.memory_space<vmem>>, vector<1x32x128xf32>
    %2 = vector.shape_cast %1 : vector<1x32x128xf32> to vector<32x128xf32>
    %cst = arith.constant dense<0.000000e+00> : vector<8x128xf32>
    %3 = tpu.matmul %0, %2, %cst {dimension_numbers = #tpu.dot_dimension_numbers<[1], [0], [0], [1], [0, 0, 1, 1], [], []>} : vector<8x32xf32>, vector<32x128xf32>, vector<8x128xf32> -> vector<8x128xf32>
    %c0_4 = arith.constant 0 : index
    %c0_5 = arith.constant 0 : index
    %c0_6 = arith.constant 0 : index
    %4 = vector.load %arg5[%c0_4, %c0_5, %c0_6] : memref<1x1x128xf32, #tpu.memory_space<vmem>>, vector<1x1x128xf32>
    %5 = vector.shape_cast %4 : vector<1x1x128xf32> to vector<128xf32>
    %6 = vector.shape_cast %5 : vector<128xf32> to vector<1x128xf32>
    %7 = vector.broadcast %6 : vector<1x128xf32> to vector<8x128xf32>
    %8 = arith.addf %3, %7 : vector<8x128xf32>
    %c0_7 = arith.constant 0 : index
    %c0_8 = arith.constant 0 : index
    %c0_9 = arith.constant 0 : index
    %9 = vector.load %arg6[%c0_7, %c0_8, %c0_9] : memref<1x8x128xf32, #tpu.memory_space<vmem>>, vector<1x8x128xf32>
    %10 = vector.shape_cast %9 : vector<1x8x128xf32> to vector<8x128xf32>
    %11 = vector.shape_cast %8 : vector<8x128xf32> to vector<1x8x128xf32>
    tpu.vector_store %arg6[%c0_7, %c0_8, %c0_9], %11 {strides = array<i32>} : memref<1x8x128xf32, #tpu.memory_space<vmem>>, vector<1x8x128xf32>,
    return
  }
  func.func @transform_0(%arg0: i32, %arg1: i32, %arg2: memref<3xi32, #tpu.memory_space<smem>>) -> (i32, i32) {
    %c0_i32 = arith.constant 0 : i32
    %c0_i32_0 = arith.constant 0 : i32
    %c0_i32_1 = arith.constant 0 : i32
    return %c0_i32, %c0_i32_0 : i32, i32
  }
  func.func @transform_1(%arg0: i32, %arg1: i32, %arg2: memref<3xi32, #tpu.memory_space<smem>>) -> (i32, i32, i32) {
    %0 = arith.index_cast %arg0 : i32 to index
    %1 = memref.load %arg2[%0] : memref<3xi32, #tpu.memory_space<smem>>
    %c0_i32 = arith.constant 0 : i32
    %c0_i32_0 = arith.constant 0 : i32
    return %1, %c0_i32, %arg1 : i32, i32, i32
  }
  func.func @transform_2(%arg0: i32, %arg1: i32, %arg2: memref<3xi32, #tpu.memory_space<smem>>) -> (i32, i32, i32) {
    %0 = arith.index_cast %arg0 : i32 to index
    %1 = memref.load %arg2[%0] : memref<3xi32, #tpu.memory_space<smem>>
    %c0_i32 = arith.constant 0 : i32
    %c0_i32_0 = arith.constant 0 : i32
    return %1, %c0_i32, %arg1 : i32, i32, i32
  }
  func.func @transform_3(%arg0: i32, %arg1: i32, %arg2: memref<3xi32, #tpu.memory_space<smem>>) -> (i32, i32, i32) {
    %c0_i32 = arith.constant 0 : i32
    %c0_i32_0 = arith.constant 0 : i32
    return %arg0, %c0_i32, %arg1 : i32, i32, i32
  }
}

</mosaic_0001>

<bundles_post_ra>
// kernel: tpu_custom_call.1
= control target key start
LH: loop header
LB: loop body
LE: loop exit
PB: predicated region body
PF: predicated region fallthrough
CT: control target
= control target key end

     0   :  { %s1102_s0 = inlined_call_operand.hbm [shape: s32[3], index: 0, kind: input, shape index: {}]   ;;  %s1103_s1 = inlined_call_operand.hbm [shape: f32[8,32], index: 1, kind: input, shape index: {}]   ;;  %s1104_s2 = inlined_call_operand.hbm [shape: f32[4,32,128], index: 2, kind: input, shape index: {}]   ;;  %s1105_s3 = inlined_call_operand.vmem [shape: f32[4,1,128], index: 3, kind: input, shape index: {}]   ;;  %s1106_s4 = inlined_call_operand.hbm [shape: f32[3,8,128], index: 4, kind: output, shape index: {}]  }
   0x1   :  { %1117 = sst [smem:[#allocation18_spill]] %s1103_s1  ;;  %s615_s17 = scalar_lea.hbm %s1102_s0, 16 }
   0x2   :  { %p616_p0 = scmp.ne.s32.totalorder %s1102_s0, %s615_s17  ;;  %p619_p1 = scmp.lt.u32.totalorder %s615_s17, %s1102_s0 }
   0x4   :  { %p621_p2 = pnand %p619_p1, %p616_p0 }
   0x6   :  { %624 = shalt.err (!%p621_p2)  }
   0x7   :  { %s797_s22 = smov [#allocation3]  }
   0x8   :  { %10 = dma.hbm_to_smem %s1102_s0, 16, %s797_s22, [#allocation2] }
   0x9   :  { %747 = dma.done.wait [#allocation2], 16 }
   0xa   :  { %748 = vsyncadd [#allocation2], 4294967280 }
   0xb   :  { %12 = sfence }
   0xc   :  { %13 = vsyncpa [#allocation5], 0 }
   0xd   :  { %14 = vsyncpa [#allocation8], 0 }
   0xe   :  { %16 = vsyncpa [#allocation8 + $0x1], 0 }
   0xf   :  { %17 = vsyncpa [#allocation6], 0 }
  0x10   :  { %19 = vsyncpa [#allocation6 + $0x1], 0  ;;  %s843_s25 = smov 0   ;;  %s845_s26 = smov 0  }
  0x11   :  { %s847_s27 = smov 0   ;;  %s849_s28 = smov 0  }
  0x12   :  { %s851_s29 = smov 0   ;;  %s853_s30 = smov 0  }
  0x13   :  { %s855_s0 = smov 0   ;;  %s857_s5 = smov 0  }
  0x14   :  { %s859_s6 = smov 0  }
  0x15 LB: > { %s467_s7 = sadd.s32 4294967295, %s795_s6   ;;  %s468_s8 = sadd.s32 4294967294, %s795_s6   ;;  %s795_s6 = sphi %s859_s6, %s25_s6   ;;  %s791_s5 = sphi %s857_s5, %s1147_s5   ;;  %s787_s0 = sphi %s855_s0, %s1146_s0   ;;  %s783_s30 = sphi %s853_s30, %s1145_s30   ;;  %s779_s29 = sphi %s851_s29, %s1144_s29   ;;  %s775_s28 = sphi %s849_s28, %s1143_s28   ;;  %s771_s27 = sphi %s847_s27, %s1142_s27   ;;  %s767_s26 = sphi %s845_s26, %s1141_s26   ;;  %s763_s25 = sphi %s843_s25, %s1140_s25  }
  0x16   : > { %s37_s9 = sadd.s32 1, %s791_s5  ;;  %s62_s10 = sld [smem:[#allocation3 + %s791_s5]] }
  0x17   : > { %p39_p3 = scmp.ge.s32.totalorder %s37_s9, 3  ;;  %s69_s11 = sadd.s32 1, %s783_s30 }
  0x18   : > { %p76_p4 = scmp.ne.s32.totalorder %s783_s30, %s779_s29  ;;  %p77_p5 = scmp.eq.s32.totalorder %s795_s6, 0 }
  0x19   : > { %s1149_s9 = smov (%p39_p3, %s37_s9), 0  ;;  %p82_p6 = scmp.ne.s32.totalorder %s779_s29, %s775_s28 }
  0x1a   : > { %1118 = sst [smem:[#allocation16_spill]] %s1149_s9  ;;  %p898_p7 = scmp.eq.s32.totalorder %s467_s7, 0 }
  0x1b   : > { %s63_s12 = sld [smem:[#allocation3 + %s1149_s9]]  ;;  %s122_s14 = ssub.s32 %s791_s5, %s1149_s9 }
  0x1c   : > { %s1119_s13 = scalar_select %p898_p7, 1, 0 }
  0x1d   : > { %s127_s15 = sadd.s32 1, %s771_s27  ;;  %p907_p8 = por %p898_p7, %p82_p6 }
  0x1e   : > { %p125_p9 = scmp.eq.s32.totalorder %s122_s14, 0  ;;  %p137_p10 = scmp.ne.s32.totalorder %s771_s27, %s767_s26 }
  0x1f   : > { %s1120_s16 = scalar_select %p907_p8, 1, 0 }
  0x20   : > { %p138_p11 = scmp.eq.s32.totalorder %s467_s7, 2  ;;  %p143_p13 = scmp.ne.s32.totalorder %s767_s26, %s763_s25 }
  0x21   : > { %s914_s17 = scalar_select %p125_p9, %s771_s27, %s127_s15  }
  0x22   : > { %p916_p12 = por %p138_p11, %p137_p10  ;;  %s64_s19 = ssub.s32 %s62_s10, %s63_s12 }
  0x23   : > { %p144_p0 = scmp.eq.s32.totalorder %s468_s8, 2  ;;  %p67_p1 = scmp.eq.s32.totalorder %s64_s19, 0 }
  0x24   : > { %s1121_s18 = scalar_select %p916_p12, 1, 0 }
  0x25   : > { %p469_p2 = scmp.ge.s32.totalorder %s795_s6, 1  ;;  %p923_p3 = por %p144_p0, %p143_p13 }
  0x26   : > { %p151_p6 = scmp.lt.s32.totalorder %s795_s6, 4  ;;  %s798_s23 = smov [#allocation4]  }
  0x27   : > { %s1122_s20 = scalar_select %p923_p3, 1, 0 }
  0x28   : > { %s929_s21 = scalar_select %p67_p1, %s783_s30, %s69_s11  }
  0x29   : > { %p931_p9 = pnand %p469_p2, %p151_p6  ;;  %s164_s24 = sshll.u32 %s798_s23, 4  ;;  %s165_s24 = int_to_ptr.vmem [resolvable:$true] %s164_s24 }
  0x2a   : > { %1123 = sst [smem:[#allocation17_spill]] %s929_s21  ;;  %p942_p11 = por %p77_p5, %p76_p4 }
  0x2b   : > { %s1124_s22 = scalar_select %p931_p9, 1, 0 }
  0x2c   : > { %p518_p10 = pneg %p931_p9  ;;  %p1108_p13 = scmp.lt.s32.totalorder %s795_s6, 3 }
  0x2d   : > { %s1125_s28 = scalar_select %p942_p11, 1, 0 }
  0x2e   : > { %p949_p0 = pnand %p518_p10, %p898_p7  ;;  %p957_p1 = pnand %p1108_p13, %p942_p11 }
  0x2f   : > { %s175_s10 = sand.u32 1, %s783_s30   ;;  %s1128_s1 = sld [smem:[#allocation18_spill]] }
  0x30   : > { %s1127_s8 = scalar_select %p957_p1, 1, 0 }
  0x31   : > { %p627_p5 = pneg %p949_p0 }
  0x35   : > { %s625_s14 = scalar_lea.hbm %s1128_s1, 128 }
  0x36   : > { %p626_p4 = scmp.ne.s32.totalorder %s1128_s1, %s625_s14  ;;  %p632_p10 = scmp.lt.u32.totalorder %s625_s14, %s1128_s1 }
  0x38   : > { %p628_p2 = pnand %p627_p5, %p626_p4 }
  0x3a   : > { %p629_p6 = pneg %p628_p2 }
  0x3c   : > { %p634_p13 = pnand %p632_p10, %p629_p6 }
  0x3e   : > { %637 = shalt.err (!%p634_p13)
}
  0x3f   : > { %s638_s21 = scalar_lea.vmem %s165_s24, 128  ;;  %p646_p7 = scmp.lt.s32.totalorder %s165_s24, %s165_s24 }
  0x40   : > { %p639_p3 = scmp.ne.s32.totalorder %s165_s24, %s638_s21  ;;  %p647_p9 = scmp.lt.s32.totalorder %s638_s21, %s638_s21 }
  0x42   : > { %p641_p12 = pnand %p639_p3, %p627_p5  ;;  %p648_p1 = por %p647_p9, %p646_p7 }
  0x44   : > { %p642_p8 = pneg %p641_p12 }
  0x46   : > { %p649_p11 = pnand %p648_p1, %p642_p8 }
  0x48   : > { %652 = shalt.err (!%p649_p11)
}
  0x49   : > { %521 = dma.hbm_to_vmem [thread:$0]  (!%p949_p0), %s1128_s1, 128, %s165_s24, [#allocation5]  }
  0x4a   : > { %s472_s9 = sshll.u32 %s175_s10, 5  ;;  %p1129_p7 = scmp.ne.s32.totalorder %s1125_s28, 0 }
  0x4b   : > { %p1130_p8 = scmp.lt.s32.totalorder %s795_s6, 3  ;;  %s179_s15 = scalar_lea.vmem [#allocation7], %s472_s9 }
  0x4c   : > { %s510_s21 = scalar_select %p1129_p7, [#allocation3], [#allocation10] }
  0x4d   : > { %s511_s14 = scalar_select %p1129_p7, %s791_s5, 0 }
  0x4e   : > { %s1151_s21 = smov (!%p1130_p8, %s510_s21), [#allocation11]  ;;  %p1131_p12 = pmov %p1130_p8 }
  0x4f   : > { %s188_s19 = sshll.u32 %s179_s15, 4  ;;  %s998_s28 = scalar_lea.sflag [#allocation8], %s175_s10  ;;  %s989_s19 = int_to_ptr.vmem [resolvable:$true] %s188_s19 }
  0x50   : > { %s1153_s14 = smov (!%p1131_p12, %s511_s14), 0  ;;  %p1132_p9 = scmp.ne.s32.totalorder %s1127_s8, 0 }
  0x51   : > { %s180_s7 = sld [smem:[%s1151_s21 + %s1153_s14]]  ;;  %s658_s14 = scalar_lea.hbm %s1104_s2, 2048 }
  0x52   : > { %p655_p11 = pneg %p1132_p9 }
  0x57   : > { %s485_s23 = sshll.u32 %s180_s7, 9 }
  0x58   : > { %s994_s24 = scalar_lea.hbm %s1104_s2, %s485_s23 }
  0x59   : > { %s653_s1 = scalar_lea.hbm %s994_s24, 512  ;;  %p659_p1 = scmp.lt.u32.totalorder %s994_s24, %s1104_s2 }
  0x5a   : > { %p654_p3 = scmp.ne.s32.totalorder %s994_s24, %s653_s1  ;;  %p660_p4 = scmp.lt.u32.totalorder %s658_s14, %s653_s1 }
  0x5b   : > { %p662_p2 = scmp.lt.u32.totalorder %s653_s1, %s994_s24 }
  0x5c   : > { %p656_p13 = pnand %p655_p11, %p654_p3  ;;  %p661_p5 = por %p660_p4, %p659_p1 }
  0x5e   : > { %p657_p0 = pneg %p656_p13  ;;  %p663_p6 = por %p662_p2, %p661_p5 }
  0x60   : > { %p664_p10 = pnand %p663_p6, %p657_p0 }
  0x62   : > { %667 = shalt.err (!%p664_p10)
}
  0x63   : > { %s668_s10 = scalar_lea.vmem %s989_s19, 512  ;;  %s799_s23 = smov [#allocation7]  }
  0x64   : > { %p669_p7 = scmp.ne.s32.totalorder %s989_s19, %s668_s10  ;;  %s673_s11 = sshll.u32 %s799_s23, 4  ;;  %s674_s11 = int_to_ptr.vmem [resolvable:$false] %s673_s11 }
  0x65   : > { %s675_s12 = scalar_lea.vmem %s674_s11, 1024  ;;  %p676_p3 = scmp.lt.s32.totalorder %s989_s19, %s674_s11 }
  0x66   : > { %p671_p8 = pnand %p669_p7, %p655_p11  ;;  %p677_p13 = scmp.lt.s32.totalorder %s675_s12, %s668_s10 }
  0x68   : > { %p672_p12 = pneg %p671_p8  ;;  %p678_p1 = por %p677_p13, %p676_p3 }
  0x6a   : > { %p679_p4 = pnand %p678_p1, %p672_p12 }
  0x6c   : > { %682 = shalt.err (!%p679_p4)
}
  0x6d   : > { %s800_s1 = smov 128   ;;  %s801_s9 = smov 8  }
  0x6e   : > { %527 = dma.hbm_to_vmem [thread:$0]  (!%p1132_p9), %s994_s24, 512, %s989_s19, %s998_s28, %s800_s1, %s800_s1, %s801_s9  }
  0x6f   : > { %p1133_p11 = scmp.ne.s32.totalorder %s1124_s22, 0 }
  0x70   : > { %p1134_p0 = scmp.ne.s32.totalorder (!%p1133_p11), %s1119_s13, 0 }
  0x71   : > { %211 = sbr.rel (%p1133_p11) target bundleno = 363 (0x16b), region = 32 }
  0x78   : > { %750 = dma.done.wait (%p1134_p0), [#allocation5], 128  }
  0x79   : > { %752 = vsyncadd (%p1134_p0), [#allocation5], 4294967168  ;;  %s217_s21 = sand.u32 1, %s779_s29   ;;  %p1135_p5 = scmp.ne.s32.totalorder %s1120_s16, 0 }
  0x7a   : > { %s477_s14 = sshll.u32 %s217_s21, 5  ;;  %s218_s7 = scalar_lea.sflag [#allocation8], %s217_s21 }
  0x7b   : > { %s221_s15 = scalar_lea.vmem [#allocation7], %s477_s14 }
  0x7c   : > { %754 = dma.done.wait (%p1135_p5), %s218_s7, 512  }
  0x7d   : > { %756 = vsyncadd (%p1135_p5), %s218_s7, 4294966784  ;;  %v802_v0 = vmov 0.0|0.0   ;;  %vm803_vm0 = vmmov 0   ;;  %v804_v1 = vmov 0.0   ;;  %v261_v2 = vld [vmem:[%s221_s15] sm:$0xff]  ;;  %v262_v3 = vld [vmem:[%s221_s15 + $0x8] sm:$0xff] }
  0x7e   : > { %502 = vmatprep.subr.bf16.mxu0 %v802_v0  ;;  %499 = vmatprep.mubr.msk.f32.mxu0 %vm803_vm0, %v804_v1  ;;  %v263_v4 = vld [vmem:[%s221_s15 + $0x10] sm:$0xff]  ;;  %v503_v5 = vpack.c.bf16 %v262_v3, %v261_v2  ;;  %v264_v6 = vld [vmem:[%s221_s15 + $0x18] sm:$0xff]  ;;  %vm272_vm1 = vcmask 261120   ;;  %s252_s13 = sld [smem:[#allocation3 + %s787_s0]]  ;;  %s248_s16 = sand.u32 1, %s767_s26  }
  0x7f   : > { %v506_v7 = vpack.c.bf16 %v264_v6, %v263_v4  ;;  %v260_v8 = vld [vmem:[#allocation4] sm:$0xff]  ;;  %s478_s22 = sshll.u32 %s248_s16, 3  ;;  %s482_s28 = sshll.u32 %s787_s0, 7 }
  0x80   : > { %504 = vmatpush3.bf16.msra.mxu0 %v503_v5  ;;  %s250_s10 = scalar_lea.vmem [#allocation9], %s478_s22  ;;  %s1046_s1 = scalar_lea.hbm %s1106_s4, %s482_s28 }
  0x81   : > { %505 = vmatprep.subr.bf16.mxu0 %v802_v0  ;;  %s362_s23 = sshll.u32 %s250_s10, 4  ;;  %s348_s9 = scalar_lea.sflag [#allocation6], %s248_s16  ;;  %s1048_s23 = int_to_ptr.vmem [resolvable:$true] %s362_s23 }
  0x82   : > { %s683_s21 = scalar_lea.vmem %s1048_s23, 128  ;;  %p1136_p6 = scmp.ne.s32.totalorder %s1121_s18, 0 }
  0x83   : > { %p684_p2 = scmp.ne.s32.totalorder %s1048_s23, %s683_s21  ;;  %s805_s0 = smov [#allocation9]  }
  0x84   : > { %507 = vmatpush3.bf16.msra.mxu0 %v506_v7  ;;  %p253_p9 = scmp.lt.s32.totalorder %s252_s13, 3  ;;  %s687_s14 = sshll.u32 %s805_s0, 4  ;;  %s688_s14 = int_to_ptr.vmem [resolvable:$false] %s687_s14 }
  0x85   : > { %p685_p10 = pnand %p684_p2, %p1136_p6  ;;  %s689_s7 = scalar_lea.vmem %s688_s14, 256 }
  0x86   : > { %s1155_s13 = smov (!%p253_p9, %s252_s13), 3  ;;  %p690_p8 = scmp.lt.s32.totalorder %s1048_s23, %s688_s14 }
  0x87   : > { %500 = vmatmul.mubr.msk.f32.vlgmr.msra.gmra.mrb[0].mxu0 %vm272_vm1, %v260_v8  ;;  %s258_s24 = scalar_lea.vmem %s1105_s3, %s1155_s13  ;;  %p686_p7 = pneg %p685_p10 }
  0x88   : > { %v479_v9 = vld [vmem:[%s258_s24] ss:$0 sm:$0xff]  ;;  %p691_p12 = scmp.lt.s32.totalorder %s689_s7, %s683_s21 }
  0x8a   : > { %p692_p3 = por %p691_p12, %p690_p8 }
  0x8c   : > { %p693_p13 = pnand %p692_p3, %p686_p7 }
 0x15a   : > { %v342_v10 = vpop.f32.mrb[0].mxu0 }
 0x15b   : > { %v343_v11 = vadd.f32 %v479_v9, %v342_v10  ;;  %v501_v12 = vpop.f32.mrb[1].mxu0 }
 0x15d   : > { %346 = vst [vmem:[%s250_s10] sm:$0xff] %v343_v11 }
 0x15e   : > { %696 = shalt.err (!%p693_p13)
}
 0x15f   : > { %s697_s15 = scalar_lea.hbm %s1046_s1, 128  ;;  %s701_s22 = scalar_lea.hbm %s1106_s4, 384 }
 0x160   : > { %p698_p1 = scmp.ne.s32.totalorder %s1046_s1, %s697_s15  ;;  %p702_p0 = scmp.lt.u32.totalorder %s1046_s1, %s1106_s4 }
 0x161   : > { %p703_p5 = scmp.lt.u32.totalorder %s701_s22, %s697_s15  ;;  %p705_p2 = scmp.lt.u32.totalorder %s697_s15, %s1046_s1 }
 0x162   : > { %p699_p4 = pnand %p698_p1, %p1136_p6 }
 0x163   : > { %p704_p9 = por %p703_p5, %p702_p0 }
 0x164   : > { %p700_p11 = pneg %p699_p4 }
 0x165   : > { %p706_p10 = por %p705_p2, %p704_p9 }
 0x167   : > { %p707_p7 = pnand %p706_p10, %p700_p11 }
 0x169   : > { %710 = shalt.err (!%p707_p7)
}
 0x16a   : > { %516 = dma.vmem_to_hbm [thread:$0]  (%p1136_p6), %s1048_s23, 128, %s1046_s1, %s348_s9  }
 0x16b PF: > { %p535_p8 = scmp.ge.s32.totalorder %s795_s6, 2  ;;  %s374_s24 = sand.u32 1, %s763_s25  }
 0x16c   : > { %p1137_p12 = scmp.ne.s32.totalorder %s1122_s20, 0  ;;  %s375_s28 = scalar_lea.sflag [#allocation6], %s374_s24 }
 0x16e   : > { %p529_p3 = pnand %p535_p8, %p1137_p12 }
 0x170   : > { %758 = dma.done.wait (!%p529_p3), %s375_s28, 128  }
 0x171   : > { %760 = vsyncadd (!%p529_p3), %s375_s28, 4294967168  ;;  %s25_s6 = sadd.s32 1, %s795_s6   ;;  %s1138_s18 = sld [smem:[#allocation17_spill]] }
 0x172   : > { %p22_p13 = scmp.ge.s32.totalorder %s25_s6, 5   ;;  %s1139_s10 = sld [smem:[#allocation16_spill]] }
 0x173   : > { %s1140_s25 = smov %s767_s26  ;;  %s1141_s26 = smov %s771_s27 }
 0x174   : > { %s1142_s27 = smov %s914_s17  ;;  %s1143_s28 = smov %s779_s29 }
 0x175   : > { %s1144_s29 = smov %s783_s30  ;;  %s1146_s0 = smov %s791_s5 }
 0x176   :  { %24 = sbr.rel (!%p22_p13) target bundleno = 21 (0x15), region = 85 }
 0x177   : > { %s1145_s30 = smov %s1138_s18 }
 0x178   : > { %s1147_s5 = smov %s1139_s10 }
 0x17d   :  { %380 = vsyncpa [#allocation5], 1 }
 0x17e   :  { %382 = vsyncpa [#allocation5 + $0x1], 1 }
 0x17f   :  { %383 = vsyncpa [#allocation8], 1 }
 0x180   :  { %385 = vsyncpa [#allocation8 + $0x1], 1 }
 0x181   :  { %386 = vsyncpa [#allocation6], 1 }
 0x182   :  { %388 = vsyncpa [#allocation6 + $0x1], 1 }

</bundles_post_ra>
